<compile_context>
chip_gen: v7x
topology: tpu7x:2x2x1
jax: 0.10.0
libtpu: 0.0.40
codegen_flags: <defaults>
</compile_context>

<pallas_src>
import functools
import math

import jax
import jax.numpy as jnp
from jax.experimental import pallas as pl
from jax.experimental.pallas import tpu as pltpu


def _round_up(a, b):
    return (a + b - 1) // b * b


def _pad_lanes(c):
    return _round_up(max(int(c), 1), 128)


def _pad_sublanes(r):
    return _round_up(max(int(r), 1), 8)


def _vmem_limit_bytes():
    """Generation-aware VMEM limit: ~102 MiB on 128-MiB parts (v5e/v6e), ~48 MiB on 64-MiB parts."""
    cap = 64 * 1024 * 1024
    try:
        info = pltpu.get_tpu_info()
        cap = int(getattr(info, "vmem_capacity_bytes", cap) or cap)
    except Exception:
        pass
    return max(32 * 1024 * 1024, min(cap - 16 * 1024 * 1024, int(cap * 0.8)))


def _divisor_tile(n_pad, cap):
    """Largest multiple-of-128 divisor of n_pad that is <= cap (n_pad is a multiple of 128)."""
    m = n_pad // 128
    best = 128
    for d in range(1, m + 1):
        if m % d == 0 and 128 * d <= cap:
            best = 128 * d
    return best


def _choose_streamed_tiling(n, lap_bytes, max_tm=512, max_tk=2048):
    """Pick (n_pad, tm, tk) for the streamed-L path: large panels (low per-step fixed
    overhead) without blowing up HBM traffic through excessive padding."""
    best = None
    for align in (128, 256, 512, 1024):
        n_pad = _round_up(max(n, 1), align)
        tm = _divisor_tile(n_pad, max_tm)
        tk = _divisor_tile(n_pad, max_tk)
        steps = (n_pad // tm) * (n_pad // tk)
        # one pass over L in HBM bytes + ~0.35us fixed cost per grid step (~400 KB of HBM time)
        cost = n_pad * n_pad * lap_bytes + steps * 400_000
        if best is None or cost < best[0]:
            best = (cost, n_pad, tm, tk)
    return best[1], best[2], best[3]


def _scnn_kernel(l_ref, x_ref, w_ref, y_ref, xk_ref, acc_ref, *,
                 conv_order_down, n_pad, tm, tk, n_powers, l_resident, update_func):
    D = conv_order_down
    P = n_powers

    p = pl.program_id(0)                 # Chebyshev power index, 0 .. P-1 (outermost)
    i = pl.program_id(1)                 # output / L row tile
    k = pl.program_id(2)                 # contraction (L column) tile
    nk = pl.num_programs(2)

    row_start = pl.multiple_of(i * tm, tm)
    col_start = pl.multiple_of(k * tk, tk)

    # One-time copy of x into chain slot 0 (identity term + seed of both chains), chunked
    # to keep vreg pressure bounded.
    @pl.when(jnp.logical_and(jnp.logical_and(p == 0, i == 0), k == 0))
    def _seed():
        chunk = min(256, n_pad)
        for r0 in range(0, n_pad, chunk):
            sz = min(chunk, n_pad - r0)
            xk_ref[pl.ds(r0, sz), :] = x_ref[pl.ds(r0, sz), :].astype(jnp.float32)

    if l_resident:
        # L plane is fully VMEM-resident; slice the (tm, tk) panel in-kernel.
        lblk = l_ref[0, pl.ds(row_start, tm), pl.ds(col_start, tk)]
    else:
        # L panel streamed from HBM by the BlockSpec pipeline.
        lblk = l_ref[0]

    # Scalar slot select (free on the scalar unit): both chains start from x (slot 0);
    # otherwise read the previous power (slot p).
    src_slot = jnp.where(p == D, 0, p)
    src = xk_ref[pl.ds(src_slot * n_pad + col_start, tk), :].astype(lblk.dtype)

    partial = jnp.dot(lblk, src, preferred_element_type=jnp.float32)   # (tm, cin) f32

    @pl.when(k == 0)
    def _init():
        acc_ref[...] = partial

    @pl.when(k > 0)
    def _acc():
        acc_ref[...] = acc_ref[...] + partial

    # Finished power for this row tile feeds the *next* power; the last power is consumed
    # directly from acc_ref by the epilogue (never stored into the chain scratch).
    @pl.when(jnp.logical_and(k == nk - 1, p < P - 1))
    def _store_power():
        xk_ref[pl.ds((p + 1) * n_pad + row_start, tm), :] = acc_ref[...]

    # Epilogue: once per row tile, on the last contraction step of the last power.
    # K small (tm, cin) @ (cin, cout) dots summed in f32 (no lane-relayout concat).
    @pl.when(jnp.logical_and(p == P - 1, k == nk - 1))
    def _emit():
        y = jnp.dot(acc_ref[...], w_ref[P], preferred_element_type=jnp.float32)
        for q in range(P):                                   # static unroll
            xq = xk_ref[pl.ds(q * n_pad + row_start, tm), :]
            y = y + jnp.dot(xq, w_ref[q], preferred_element_type=jnp.float32)
        if update_func == "sigmoid":
            y = jax.nn.sigmoid(y)
        elif update_func == "relu":
            y = jnp.maximum(y, 0.0)
        y_ref[pl.ds(row_start, tm), :] = y.astype(y_ref.dtype)


def scnn_layer_forward(x, laplacian_down, laplacian_up, weight, *,
                       conv_order_down, conv_order_up, update_func=None,
                       laplacian_dtype=jnp.bfloat16,
                       allow_resident=True, tile_m=None, tile_k=None):
    """Pallas-backed SCNN layer forward.

    x:               [n_simplices, in_channels]
    laplacian_down:  [n_simplices, n_simplices]  (dense; only used if conv_order_down > 0)
    laplacian_up:    [n_simplices, n_simplices]  (dense; only used if conv_order_up > 0)
    weight:          [in_channels, out_channels, K], K = 1 + down + up  (torch layout)
    returns          [n_simplices, out_channels]  with dtype of x
    """
    # TODO(synk): aggr_norm=True path (row-sum normalization of the operator) not implemented.
    # TODO(synk): v7x dual-TensorCore chain-parallel split (down/up chains on separate cores with
    #             a tiny fuse op), fp8/int8 Laplacian quantization, and lane-dense (transposed)
    #             chain storage are left out; the padded chain footprint is budgeted instead.
    D, U = int(conv_order_down), int(conv_order_up)
    P = D + U
    if P == 0:
        raise ValueError("at least one of conv_order_down / conv_order_up must be > 0")

    n, cin = x.shape
    cout = weight.shape[1]
    K = 1 + P
    assert weight.shape == (cin, cout, K)

    lap_dtype = jnp.dtype(laplacian_dtype)
    lap_bytes = lap_dtype.itemsize
    x_bytes = jnp.dtype(x.dtype).itemsize
    out_bytes = x_bytes
    n_planes = (1 if D > 0 else 0) + (1 if U > 0 else 0)

    vmem_limit = _vmem_limit_bytes()

    def fixed_vmem_bytes(n_pad, tm):
        # Lane/sublane-padded footprint of everything VMEM-resident besides L.
        chain = _pad_sublanes(P * n_pad) * _pad_lanes(cin) * 4            # power-chain scratch
        acc = _pad_sublanes(tm) * _pad_lanes(cin) * 4                     # row-tile accumulator
        x_buf = 2 * _pad_sublanes(n_pad) * _pad_lanes(cin) * x_bytes      # resident x
        w_buf = 2 * K * _pad_sublanes(cin) * _pad_lanes(cout) * 4         # resident weights
        y_buf = 2 * _pad_sublanes(n_pad) * _pad_lanes(cout) * out_bytes   # resident output
        return chain + acc + x_buf + w_buf + y_buf

    headroom = 2 * 1024 * 1024

    if tile_m is None and tile_k is None:
        n_pad_r = _round_up(max(n, 1), 128)
        tm_r = _divisor_tile(n_pad_r, 512)
        resident_bytes = 2 * n_pad_r * n_pad_r * lap_bytes + fixed_vmem_bytes(n_pad_r, tm_r)
        if allow_resident and resident_bytes + headroom <= vmem_limit:
            l_resident = True
            n_pad, tm, tk = n_pad_r, tm_r, n_pad_r            # full-width contraction per step
        else:
            l_resident = False
            n_pad, tm, tk = _choose_streamed_tiling(n, lap_bytes)
    else:
        # Explicit tiling override (mainly for testing the streamed path).
        tm = _round_up(int(tile_m or 128), 128)
        tk = _round_up(int(tile_k or 128), 128)
        n_pad = _round_up(max(n, 1), math.lcm(tm, tk))
        resident_bytes = 2 * n_pad * n_pad * lap_bytes + fixed_vmem_bytes(n_pad, tm)
        l_resident = bool(allow_resident) and resident_bytes + headroom <= vmem_limit

    def pad2(a):
        a = a.astype(lap_dtype)
        return jnp.pad(a, ((0, n_pad - a.shape[0]), (0, n_pad - a.shape[1])))

    planes = []
    if D > 0:
        planes.append(pad2(laplacian_down))
    if U > 0:
        planes.append(pad2(laplacian_up))
    l_stack = jnp.stack(planes, axis=0)                       # (n_planes, n_pad, n_pad)

    if D > 0 and U > 0:
        plane_of = lambda p: jnp.where(p < D, 0, 1)
    else:
        plane_of = lambda p: 0

    if l_resident:
        # Full plane resident in VMEM: each plane is DMA'd from HBM exactly once (the block
        # index only changes when the chain switches Laplacian).
        l_spec = pl.BlockSpec((1, n_pad, n_pad), lambda p, i, k: (plane_of(p), 0, 0))
    else:
        # Stream (tm, tk) panels of the selected plane; L is re-read once per power.
        l_spec = pl.BlockSpec((1, tm, tk), lambda p, i, k: (plane_of(p), i, k))

    x_pad = jnp.pad(x, ((0, n_pad - n), (0, 0)))
    # torch weight layout is [cin, cout, K]; reorder to [K, cin, cout] so term q hits w[q].
    w_kio = jnp.transpose(weight, (2, 0, 1)).astype(jnp.float32)

    kernel = functools.partial(
        _scnn_kernel, conv_order_down=D, n_pad=n_pad, tm=tm, tk=tk,
        n_powers=P, l_resident=l_resident, update_func=update_func)

    l_reads = n_planes if l_resident else P
    cost = pl.CostEstimate(
        flops=2 * P * n_pad * n_pad * cin + 2 * n_pad * K * cin * cout,
        transcendentals=n_pad * cout if update_func == "sigmoid" else 0,
        bytes_accessed=(l_reads * n_pad * n_pad * lap_bytes
                        + n_pad * cin * x_bytes
                        + K * cin * cout * 4
                        + n_pad * cout * out_bytes),
    )

    y_pad = pl.pallas_call(
        kernel,
        out_shape=jax.ShapeDtypeStruct((n_pad, cout), x.dtype),
        grid_spec=pltpu.PrefetchScalarGridSpec(
            num_scalar_prefetch=0,
            grid=(P, n_pad // tm, n_pad // tk),
            in_specs=[
                l_spec,
                pl.BlockSpec((n_pad, cin), lambda p, i, k: (0, 0)),        # resident x
                pl.BlockSpec((K, cin, cout), lambda p, i, k: (0, 0, 0)),   # resident weights
            ],
            # Output stays VMEM-resident and is written back to HBM exactly once at the end
            # of the grid (block index never changes); every row is written by the epilogue
            # during the last power, so no stale data is flushed.
            out_specs=pl.BlockSpec((n_pad, cout), lambda p, i, k: (0, 0)),
            scratch_shapes=[
                pltpu.VMEM((P * n_pad, cin), jnp.float32),   # chain: slot 0 = x, slots 1..P-1 = powers
                pltpu.VMEM((tm, cin), jnp.float32),          # per-row-tile f32 accumulator
            ],
        ),
        compiler_params=pltpu.CompilerParams(
            # Row axis cannot be megacore-parallel: power p of every row tile reads all rows
            # of power p-1 from the shared chain scratch.
            dimension_semantics=("arbitrary", "arbitrary", "arbitrary"),
            vmem_limit_bytes=int(vmem_limit),
        ),
        cost_estimate=cost,
    )(l_stack, x_pad, w_kio)

    return y_pad[:n]


def _reference_forward(x, ld, lu, weight, conv_order_down, conv_order_up, update_func=None):
    """Pure-JAX reference matching the PyTorch forward semantics (weight in torch layout)."""
    terms = [x]
    if conv_order_down > 0:
        xk = x
        for _ in range(conv_order_down):
            xk = ld @ xk
            terms.append(xk)
    if conv_order_up > 0:
        xk = x
        for _ in range(conv_order_up):
            xk = lu @ xk
            terms.append(xk)
    X = jnp.stack(terms, axis=2)                 # (n, cin, K)
    y = jnp.einsum("nik,iok->no", X, weight)     # weight: (cin, cout, K)
    if update_func == "sigmoid":
        y = jax.nn.sigmoid(y)
    elif update_func == "relu":
        y = jnp.maximum(y, 0.0)
    return y


def init_weight(key, in_channels, out_channels, total_order, gain=1.414):
    """xavier_uniform_ matching torch's fan computation for [cin, cout, total_order]."""
    fan_in = out_channels * total_order
    fan_out = in_channels * total_order
    bound = gain * (6.0 / (fan_in + fan_out)) ** 0.5
    return jax.random.uniform(key, (in_channels, out_channels, total_order),
                              minval=-bound, maxval=bound, dtype=jnp.float32)


if __name__ == "__main__":
    # small shapes: n_simplices=16, in_channels=4, out_channels=8, orders 2/2
    n_simplices = 16
    in_channels = 4
    out_channels = 8
    conv_order_down = 2
    conv_order_up = 2
    total_order = 1 + conv_order_down + conv_order_up

    key = jax.random.PRNGKey(0)
    kx, kd, ku, kw = jax.random.split(key, 4)

    x = jax.random.normal(kx, (n_simplices, in_channels), dtype=jnp.float32)
    a_down = jax.random.normal(kd, (n_simplices, n_simplices), dtype=jnp.float32) * 0.1
    laplacian_down = a_down + a_down.T
    a_up = jax.random.normal(ku, (n_simplices, n_simplices), dtype=jnp.float32) * 0.1
    laplacian_up = a_up + a_up.T
    weight = init_weight(kw, in_channels, out_channels, total_order)

    # 1) resident-L path, exact f32, no activation -> tight check vs reference
    y32 = scnn_layer_forward(
        x, laplacian_down, laplacian_up, weight,
        conv_order_down=conv_order_down, conv_order_up=conv_order_up,
        update_func=None, laplacian_dtype=jnp.float32)
    y32 = jax.block_until_ready(y32)
    y_ref = _reference_forward(x, laplacian_down, laplacian_up, weight,
                               conv_order_down, conv_order_up, update_func=None)
    assert y32.shape == (n_simplices, out_channels)
    assert jnp.allclose(y32, y_ref, atol=1e-4, rtol=1e-4), "f32 resident path mismatch"

    # 2) resident-L path, bf16 Laplacians + sigmoid -> loose check vs f32 reference
    ybf = scnn_layer_forward(
        x, laplacian_down, laplacian_up, weight,
        conv_order_down=conv_order_down, conv_order_up=conv_order_up,
        update_func="sigmoid", laplacian_dtype=jnp.bfloat16)
    ybf = jax.block_until_ready(ybf)
    y_ref_sig = _reference_forward(x, laplacian_down, laplacian_up, weight,
                                   conv_order_down, conv_order_up, update_func="sigmoid")
    assert ybf.shape == (n_simplices, out_channels)
    assert jnp.allclose(ybf, y_ref_sig, atol=5e-2, rtol=5e-2), "bf16 resident path mismatch"

    # 3) streamed-L path forced (multi row/col tiles) -> exercises the accumulator,
    #    chain stores and per-row-tile epilogue on a non-trivial grid.
    n2 = 200
    k2 = jax.random.split(jax.random.PRNGKey(1), 3)
    x2 = jax.random.normal(k2[0], (n2, in_channels), dtype=jnp.float32)
    a2d = jax.random.normal(k2[1], (n2, n2), dtype=jnp.float32) * 0.05
    l2d = a2d + a2d.T
    a2u = jax.random.normal(k2[2], (n2, n2), dtype=jnp.float32) * 0.05
    l2u = a2u + a2u.T
    y_str = scnn_layer_forward(
        x2, l2d, l2u, weight,
        conv_order_down=conv_order_down, conv_order_up=conv_order_up,
        update_func="relu", laplacian_dtype=jnp.float32,
        allow_resident=False, tile_m=128, tile_k=128)
    y_str = jax.block_until_ready(y_str)
    y_ref2 = _reference_forward(x2, l2d, l2u, weight,
                                conv_order_down, conv_order_up, update_func="relu")
    assert y_str.shape == (n2, out_channels)
    assert jnp.allclose(y_str, y_ref2, atol=1e-3, rtol=1e-3), "streamed path mismatch"

    print("KERNEL_OK")
</pallas_src>

<mosaic_0001>
module attributes {stable_mosaic.version = 11 : i64} {
  func.func @_scnn_kernel(%arg0: i32, %arg1: i32, %arg2: i32, %arg3: memref<1x128x128xf32, #tpu.memory_space<vmem>>, %arg4: memref<128x4xf32, #tpu.memory_space<vmem>>, %arg5: memref<5x4x8xf32, #tpu.memory_space<vmem>>, %arg6: memref<128x8xf32, #tpu.memory_space<vmem>>, %arg7: memref<512x4xf32, #tpu.memory_space<vmem>>, %arg8: memref<128x4xf32, #tpu.memory_space<vmem>>) attributes {dimension_semantics = [#tpu.dimension_semantics<arbitrary>, #tpu.dimension_semantics<arbitrary>, #tpu.dimension_semantics<arbitrary>], iteration_bounds = array<i64: 4, 1, 1>, scalar_prefetch = 0 : i64, scratch_operands = 2 : i64, tpu.core_type = #tpu.core_type<tc>, window_params = [{transform_indices = @transform_0, window_bounds = array<i64: 1, 128, 128>}, {pipeline_mode = #tpu.pipeline_mode<synchronous>, transform_indices = @transform_1, window_bounds = array<i64: 128, 4>}, {pipeline_mode = #tpu.pipeline_mode<synchronous>, transform_indices = @transform_2, window_bounds = array<i64: 5, 4, 8>}, {pipeline_mode = #tpu.pipeline_mode<synchronous>, transform_indices = @transform_3, window_bounds = array<i64: 128, 8>}]} {
    %c128_i32 = arith.constant 128 : i32
    %0 = arith.muli %arg1, %c128_i32 : i32
    %1 = tpu.assume_multiple %0, 128 : i32
    %c128_i32_0 = arith.constant 128 : i32
    %2 = arith.muli %arg2, %c128_i32_0 : i32
    %3 = tpu.assume_multiple %2, 128 : i32
    %c0_i32 = arith.constant 0 : i32
    %4 = arith.cmpi eq, %arg0, %c0_i32 : i32
    %c0_i32_1 = arith.constant 0 : i32
    %5 = arith.cmpi eq, %arg1, %c0_i32_1 : i32
    %6 = arith.andi %4, %5 : i1
    %c0_i32_2 = arith.constant 0 : i32
    %7 = arith.cmpi eq, %arg2, %c0_i32_2 : i32
    %8 = arith.andi %6, %7 : i1
    %9 = arith.extui %8 : i1 to i32
    %c0_i32_3 = arith.constant 0 : i32
    %10 = arith.cmpi ne, %9, %c0_i32_3 : i32
    scf.if %10 {
      %c0_16 = arith.constant 0 : index
      %c0_17 = arith.constant 0 : index
      %38 = vector.load %arg4[%c0_16, %c0_17] : memref<128x4xf32, #tpu.memory_space<vmem>>, vector<128x4xf32>
      %c0_18 = arith.constant 0 : index
      %c0_19 = arith.constant 0 : index
      %39 = vector.load %arg7[%c0_18, %c0_19] : memref<512x4xf32, #tpu.memory_space<vmem>>, vector<128x4xf32>
      tpu.vector_store %arg7[%c0_18, %c0_19], %38 {strides = array<i32>} : memref<512x4xf32, #tpu.memory_space<vmem>>, vector<128x4xf32>,
    } else {
    }
    %c0 = arith.constant 0 : index
    %11 = arith.index_cast %1 : i32 to index
    %12 = arith.index_cast %3 : i32 to index
    %13 = vector.load %arg3[%c0, %11, %12] : memref<1x128x128xf32, #tpu.memory_space<vmem>>, vector<1x128x128xf32>
    %14 = vector.shape_cast %13 : vector<1x128x128xf32> to vector<128x128xf32>
    %c2_i32 = arith.constant 2 : i32
    %15 = arith.cmpi eq, %arg0, %c2_i32 : i32
    %c0_i32_4 = arith.constant 0 : i32
    %16 = arith.select %15, %c0_i32_4, %arg0 : i32
    %c128_i32_5 = arith.constant 128 : i32
    %17 = arith.muli %16, %c128_i32_5 : i32
    %18 = arith.addi %17, %3 : i32
    %19 = arith.index_cast %18 : i32 to index
    %c0_6 = arith.constant 0 : index
    %20 = vector.load %arg7[%19, %c0_6] : memref<512x4xf32, #tpu.memory_space<vmem>>, vector<128x4xf32>
    %cst = arith.constant dense<0.000000e+00> : vector<128x4xf32>
    %21 = tpu.matmul %14, %20, %cst {dimension_numbers = #tpu.dot_dimension_numbers<[1], [0], [0], [1], [0, 0, 1, 1], [], []>} : vector<128x128xf32>, vector<128x4xf32>, vector<128x4xf32> -> vector<128x4xf32>
    %c0_i32_7 = arith.constant 0 : i32
    %22 = arith.cmpi eq, %arg2, %c0_i32_7 : i32
    %23 = arith.extui %22 : i1 to i32
    %c0_i32_8 = arith.constant 0 : i32
    %24 = arith.cmpi ne, %23, %c0_i32_8 : i32
    scf.if %24 {
      %c0_16 = arith.constant 0 : index
      %c0_17 = arith.constant 0 : index
      %38 = vector.load %arg8[%c0_16, %c0_17] : memref<128x4xf32, #tpu.memory_space<vmem>>, vector<128x4xf32>
      tpu.vector_store %arg8[%c0_16, %c0_17], %21 {strides = array<i32>} : memref<128x4xf32, #tpu.memory_space<vmem>>, vector<128x4xf32>,
    } else {
    }
    %c0_i32_9 = arith.constant 0 : i32
    %25 = arith.cmpi sgt, %arg2, %c0_i32_9 : i32
    %26 = arith.extui %25 : i1 to i32
    %c0_i32_10 = arith.constant 0 : i32
    %27 = arith.cmpi ne, %26, %c0_i32_10 : i32
    scf.if %27 {
      %c0_16 = arith.constant 0 : index
      %c0_17 = arith.constant 0 : index
      %38 = vector.load %arg8[%c0_16, %c0_17] : memref<128x4xf32, #tpu.memory_space<vmem>>, vector<128x4xf32>
      %39 = arith.addf %38, %21 : vector<128x4xf32>
      %c0_18 = arith.constant 0 : index
      %c0_19 = arith.constant 0 : index
      %40 = vector.load %arg8[%c0_18, %c0_19] : memref<128x4xf32, #tpu.memory_space<vmem>>, vector<128x4xf32>
      tpu.vector_store %arg8[%c0_18, %c0_19], %39 {strides = array<i32>} : memref<128x4xf32, #tpu.memory_space<vmem>>, vector<128x4xf32>,
    } else {
    }
    %c0_i32_11 = arith.constant 0 : i32
    %28 = arith.cmpi eq, %arg2, %c0_i32_11 : i32
    %c3_i32 = arith.constant 3 : i32
    %29 = arith.cmpi slt, %arg0, %c3_i32 : i32
    %30 = arith.andi %28, %29 : i1
    %31 = arith.extui %30 : i1 to i32
    %c0_i32_12 = arith.constant 0 : i32
    %32 = arith.cmpi ne, %31, %c0_i32_12 : i32
    scf.if %32 {
      %c0_16 = arith.constant 0 : index
      %c0_17 = arith.constant 0 : index
      %38 = vector.load %arg8[%c0_16, %c0_17] : memref<128x4xf32, #tpu.memory_space<vmem>>, vector<128x4xf32>
      %c1_i32 = arith.constant 1 : i32
      %39 = arith.addi %arg0, %c1_i32 : i32
      %c128_i32_18 = arith.constant 128 : i32
      %40 = arith.muli %39, %c128_i32_18 : i32
      %41 = arith.addi %40, %1 : i32
      %42 = arith.index_cast %41 : i32 to index
      %c0_19 = arith.constant 0 : index
      %43 = vector.load %arg7[%42, %c0_19] : memref<512x4xf32, #tpu.memory_space<vmem>>, vector<128x4xf32>
      tpu.vector_store %arg7[%42, %c0_19], %38 {strides = array<i32>} : memref<512x4xf32, #tpu.memory_space<vmem>>, vector<128x4xf32>,
    } else {
    }
    %c3_i32_13 = arith.constant 3 : i32
    %33 = arith.cmpi eq, %arg0, %c3_i32_13 : i32
    %c0_i32_14 = arith.constant 0 : i32
    %34 = arith.cmpi eq, %arg2, %c0_i32_14 : i32
    %35 = arith.andi %33, %34 : i1
    %36 = arith.extui %35 : i1 to i32
    %c0_i32_15 = arith.constant 0 : i32
    %37 = arith.cmpi ne, %36, %c0_i32_15 : i32
    scf.if %37 {
      %c0_16 = arith.constant 0 : index
      %c0_17 = arith.constant 0 : index
      %38 = vector.load %arg8[%c0_16, %c0_17] : memref<128x4xf32, #tpu.memory_space<vmem>>, vector<128x4xf32>
      %c4 = arith.constant 4 : index
      %c0_18 = arith.constant 0 : index
      %c0_19 = arith.constant 0 : index
      %39 = vector.load %arg5[%c4, %c0_18, %c0_19] : memref<5x4x8xf32, #tpu.memory_space<vmem>>, vector<1x4x8xf32>
      %40 = vector.shape_cast %39 : vector<1x4x8xf32> to vector<4x8xf32>
      %cst_20 = arith.constant dense<0.000000e+00> : vector<128x8xf32>
      %41 = tpu.matmul %38, %40, %cst_20 {dimension_numbers = #tpu.dot_dimension_numbers<[1], [0], [0], [1], [0, 0, 1, 1], [], []>} : vector<128x4xf32>, vector<4x8xf32>, vector<128x8xf32> -> vector<128x8xf32>
      %c0_i32_21 = arith.constant 0 : i32
      %42 = arith.addi %c0_i32_21, %1 : i32
      %43 = arith.index_cast %42 : i32 to index
      %c0_22 = arith.constant 0 : index
      %44 = vector.load %arg7[%43, %c0_22] : memref<512x4xf32, #tpu.memory_space<vmem>>, vector<128x4xf32>
      %c0_23 = arith.constant 0 : index
      %c0_24 = arith.constant 0 : index
      %c0_25 = arith.constant 0 : index
      %45 = vector.load %arg5[%c0_23, %c0_24, %c0_25] : memref<5x4x8xf32, #tpu.memory_space<vmem>>, vector<1x4x8xf32>
      %46 = vector.shape_cast %45 : vector<1x4x8xf32> to vector<4x8xf32>
      %cst_26 = arith.constant dense<0.000000e+00> : vector<128x8xf32>
      %47 = tpu.matmul %44, %46, %cst_26 {dimension_numbers = #tpu.dot_dimension_numbers<[1], [0], [0], [1], [0, 0, 1, 1], [], []>} : vector<128x4xf32>, vector<4x8xf32>, vector<128x8xf32> -> vector<128x8xf32>
      %48 = arith.addf %41, %47 : vector<128x8xf32>
      %c128_i32_27 = arith.constant 128 : i32
      %49 = arith.addi %c128_i32_27, %1 : i32
      %50 = arith.index_cast %49 : i32 to index
      %c0_28 = arith.constant 0 : index
      %51 = vector.load %arg7[%50, %c0_28] : memref<512x4xf32, #tpu.memory_space<vmem>>, vector<128x4xf32>
      %c1 = arith.constant 1 : index
      %c0_29 = arith.constant 0 : index
      %c0_30 = arith.constant 0 : index
      %52 = vector.load %arg5[%c1, %c0_29, %c0_30] : memref<5x4x8xf32, #tpu.memory_space<vmem>>, vector<1x4x8xf32>
      %53 = vector.shape_cast %52 : vector<1x4x8xf32> to vector<4x8xf32>
      %cst_31 = arith.constant dense<0.000000e+00> : vector<128x8xf32>
      %54 = tpu.matmul %51, %53, %cst_31 {dimension_numbers = #tpu.dot_dimension_numbers<[1], [0], [0], [1], [0, 0, 1, 1], [], []>} : vector<128x4xf32>, vector<4x8xf32>, vector<128x8xf32> -> vector<128x8xf32>
      %55 = arith.addf %48, %54 : vector<128x8xf32>
      %c256_i32 = arith.constant 256 : i32
      %56 = arith.addi %c256_i32, %1 : i32
      %57 = arith.index_cast %56 : i32 to index
      %c0_32 = arith.constant 0 : index
      %58 = vector.load %arg7[%57, %c0_32] : memref<512x4xf32, #tpu.memory_space<vmem>>, vector<128x4xf32>
      %c2 = arith.constant 2 : index
      %c0_33 = arith.constant 0 : index
      %c0_34 = arith.constant 0 : index
      %59 = vector.load %arg5[%c2, %c0_33, %c0_34] : memref<5x4x8xf32, #tpu.memory_space<vmem>>, vector<1x4x8xf32>
      %60 = vector.shape_cast %59 : vector<1x4x8xf32> to vector<4x8xf32>
      %cst_35 = arith.constant dense<0.000000e+00> : vector<128x8xf32>
      %61 = tpu.matmul %58, %60, %cst_35 {dimension_numbers = #tpu.dot_dimension_numbers<[1], [0], [0], [1], [0, 0, 1, 1], [], []>} : vector<128x4xf32>, vector<4x8xf32>, vector<128x8xf32> -> vector<128x8xf32>
      %62 = arith.addf %55, %61 : vector<128x8xf32>
      %c384_i32 = arith.constant 384 : i32
      %63 = arith.addi %c384_i32, %1 : i32
      %64 = arith.index_cast %63 : i32 to index
      %c0_36 = arith.constant 0 : index
      %65 = vector.load %arg7[%64, %c0_36] : memref<512x4xf32, #tpu.memory_space<vmem>>, vector<128x4xf32>
      %c3 = arith.constant 3 : index
      %c0_37 = arith.constant 0 : index
      %c0_38 = arith.constant 0 : index
      %66 = vector.load %arg5[%c3, %c0_37, %c0_38] : memref<5x4x8xf32, #tpu.memory_space<vmem>>, vector<1x4x8xf32>
      %67 = vector.shape_cast %66 : vector<1x4x8xf32> to vector<4x8xf32>
      %cst_39 = arith.constant dense<0.000000e+00> : vector<128x8xf32>
      %68 = tpu.matmul %65, %67, %cst_39 {dimension_numbers = #tpu.dot_dimension_numbers<[1], [0], [0], [1], [0, 0, 1, 1], [], []>} : vector<128x4xf32>, vector<4x8xf32>, vector<128x8xf32> -> vector<128x8xf32>
      %69 = arith.addf %62, %68 : vector<128x8xf32>
      %70 = arith.index_cast %1 : i32 to index
      %c0_40 = arith.constant 0 : index
      %71 = vector.load %arg6[%70, %c0_40] : memref<128x8xf32, #tpu.memory_space<vmem>>, vector<128x8xf32>
      tpu.vector_store %arg6[%70, %c0_40], %69 {strides = array<i32>} : memref<128x8xf32, #tpu.memory_space<vmem>>, vector<128x8xf32>,
    } else {
    }
    return
  }
  func.func @transform_0(%arg0: i32, %arg1: i32, %arg2: i32) -> (i32, i32, i32) {
    %c2_i32 = arith.constant 2 : i32
    %0 = arith.cmpi slt, %arg0, %c2_i32 : i32
    %c0_i32 = arith.constant 0 : i32
    %c1_i32 = arith.constant 1 : i32
    %1 = arith.select %0, %c0_i32, %c1_i32 : i32
    %c0_i32_0 = arith.constant 0 : i32
    %c0_i32_1 = arith.constant 0 : i32
    %c0_i32_2 = arith.constant 0 : i32
    return %1, %c0_i32_0, %c0_i32_1 : i32, i32, i32
  }
  func.func @transform_1(%arg0: i32, %arg1: i32, %arg2: i32) -> (i32, i32) {
    %c0_i32 = arith.constant 0 : i32
    %c0_i32_0 = arith.constant 0 : i32
    %c0_i32_1 = arith.constant 0 : i32
    return %c0_i32, %c0_i32_0 : i32, i32
  }
  func.func @transform_2(%arg0: i32, %arg1: i32, %arg2: i32) -> (i32, i32, i32) {
    %c0_i32 = arith.constant 0 : i32
    %c0_i32_0 = arith.constant 0 : i32
    %c0_i32_1 = arith.constant 0 : i32
    %c0_i32_2 = arith.constant 0 : i32
    return %c0_i32, %c0_i32_0, %c0_i32_1 : i32, i32, i32
  }
  func.func @transform_3(%arg0: i32, %arg1: i32, %arg2: i32) -> (i32, i32) {
    %c0_i32 = arith.constant 0 : i32
    %c0_i32_0 = arith.constant 0 : i32
    %c0_i32_1 = arith.constant 0 : i32
    return %c0_i32, %c0_i32_0 : i32, i32
  }
}

</mosaic_0001>

<bundles_post_ra>
// kernel: tpu_custom_call.1
= control target key start
LH: loop header
LB: loop body
LE: loop exit
PB: predicated region body
PF: predicated region fallthrough
CT: control target
= control target key end

     0   :  { %8 = vsyncpa [#allocation5], 0  ;;  %s2955_s0 = inlined_call_operand.hbm [shape: f32[2,128,128], index: 0, kind: input, shape index: {}]   ;;  %s2956_s1 = inlined_call_operand.vmem [shape: f32[128,4], index: 1, kind: input, shape index: {}]   ;;  %s2957_s2 = inlined_call_operand.vmem [shape: f32[5,4,8], index: 2, kind: input, shape index: {}]   ;;  %s2958_s3 = inlined_call_operand.vmem [shape: f32[128,8], index: 3, kind: output, shape index: {}]  }
   0x1   :  { %10 = vsyncpa [#allocation5 + $0x1], 0  ;;  %s2526_s12 = smov 0   ;;  %s2528_s13 = smov 0  }
   0x2   :  { %s2530_s14 = smov 0   ;;  %s2532_s15 = smov 0  }
   0x3   :  { %s2534_s16 = smov 0   ;;  %s2536_s17 = smov 0  }
   0x4 LB: > { %s1773_s18 = sadd.s32 4294967295, %s2501_s17   ;;  %s35_s19 = sadd.s32 1, %s2497_s16  ;;  %s2501_s17 = sphi %s2536_s17, %s16_s17   ;;  %s2497_s16 = sphi %s2534_s16, %s2965_s16   ;;  %s2493_s15 = sphi %s2532_s15, %s2964_s15   ;;  %s2489_s14 = sphi %s2530_s14, %s2963_s14   ;;  %s2485_s13 = sphi %s2528_s13, %s2962_s13   ;;  %s2481_s12 = sphi %s2526_s12, %s2961_s12  }
   0x5   : > { %p37_p0 = scmp.ge.s32.totalorder %s35_s19, 4  ;;  %p39_p1 = scmp.ge.s32.totalorder %s2497_s16, 2 }
   0x6   : > { %s46_s20 = sadd.s32 1, %s2489_s14  ;;  %p53_p2 = scmp.ne.s32.totalorder %s2489_s14, %s2485_s13 }
   0x7   : > { %s2967_s19 = smov (%p37_p0, %s35_s19), 0  ;;  %p54_p4 = scmp.eq.s32.totalorder %s2501_s17, 0 }
   0x8   : > { %s40_s21 = scalar_select %p39_p1, 1, 0 }
   0x9   : > { %p41_p3 = scmp.ge.s32.totalorder %s2967_s19, 2  ;;  %p59_p5 = scmp.ne.s32.totalorder %s2485_s13, %s2481_s12 }
   0xa   : > { %p60_p6 = scmp.eq.s32.totalorder %s1773_s18, 0  ;;  %p55_p7 = por %p54_p4, %p53_p2 }
   0xb   : > { %s42_s22 = scalar_select %p41_p3, 1, 0 }
   0xc   : > { %p2565_p8 = por %p60_p6, %p59_p5  ;;  %p2370_p10 = scmp.lt.s32.totalorder %s2501_s17, 4 }
   0xd   : > { %s43_s24 = ssub.s32 %s40_s21, %s42_s22  ;;  %s152_s25 = sand.u32 1, %s2489_s14  }
   0xe   : > { %p44_p9 = scmp.eq.s32.totalorder %s43_s24, 0  ;;  %s1942_s26 = sshll.u32 %s40_s21, 11 }
   0xf   : > { %s1776_s28 = sshll.u32 %s152_s25, 7  ;;  %s2577_s4 = scalar_lea.hbm %s2955_s0, %s1942_s26 }
  0x10   : > { %s2572_s27 = scalar_select %p44_p9, %s2489_s14, %s46_s20  }
  0x11   : > { %s156_s5 = scalar_lea.vmem [#allocation4], %s1776_s28  ;;  %p2579_p11 = pnand %p2370_p10, %p55_p7 }
  0x12   : > { %s165_s6 = sshll.u32 %s156_s5, 4  ;;  %s2585_s8 = scalar_lea.sflag [#allocation5], %s152_s25  ;;  %s2583_s6 = int_to_ptr.vmem [resolvable:$true] %s165_s6 }
  0x13   : > { %s2421_s9 = scalar_lea.hbm %s2577_s4, 2048  ;;  %p2423_p13 = pneg %p2579_p11 }
  0x14   : > { %p2422_p12 = scmp.ne.s32.totalorder %s2577_s4, %s2421_s9  ;;  %s2426_s12 = scalar_lea.hbm %s2955_s0, 4096 }
  0x15   : > { %p2427_p2 = scmp.lt.u32.totalorder %s2577_s4, %s2955_s0  ;;  %p2428_p3 = scmp.lt.u32.totalorder %s2426_s12, %s2421_s9 }
  0x16   : > { %p2424_p0 = pnand %p2423_p13, %p2422_p12  ;;  %p2430_p5 = scmp.lt.u32.totalorder %s2421_s9, %s2577_s4 }
  0x17   : > { %p2429_p4 = por %p2428_p3, %p2427_p2 }
  0x18   : > { %p2425_p1 = pneg %p2424_p0 }
  0x19   : > { %p2431_p6 = por %p2430_p5, %p2429_p4 }
  0x1b   : > { %p2432_p7 = pnand %p2431_p6, %p2425_p1 }
  0x1d   : > { %2435 = shalt.err (!%p2432_p7)
}
  0x1e   : > { %s2436_s21 = scalar_lea.vmem %s2583_s6, 2048  ;;  %s2503_s22 = smov [#allocation4]  }
  0x1f   : > { %p2437_p9 = scmp.ne.s32.totalorder %s2583_s6, %s2436_s21  ;;  %s2441_s24 = sshll.u32 %s2503_s22, 4  ;;  %s2442_s24 = int_to_ptr.vmem [resolvable:$false] %s2441_s24 }
  0x20   : > { %s2443_s25 = scalar_lea.vmem %s2442_s24, 4096  ;;  %p2444_p0 = scmp.lt.s32.totalorder %s2583_s6, %s2442_s24 }
  0x21   : > { %p2439_p10 = pnand %p2437_p9, %p2423_p13  ;;  %p2445_p2 = scmp.lt.s32.totalorder %s2443_s25, %s2436_s21 }
  0x23   : > { %p2440_p12 = pneg %p2439_p10  ;;  %p2446_p3 = por %p2445_p2, %p2444_p0 }
  0x25   : > { %p2447_p4 = pnand %p2446_p3, %p2440_p12 }
  0x27   : > { %2450 = shalt.err (!%p2447_p4)
}
  0x28   : > { %s2504_s26 = smov 128   ;;  %s2505_s28 = smov 8  }
  0x29   : > { %2369 = dma.hbm_to_vmem [thread:$0]  (!%p2579_p11), %s2577_s4, 2048, %s2583_s6, %s2585_s8, %s2504_s26, %s2504_s26, %s2505_s28  }
  0x2a   : > { %p1779_p13 = scmp.ge.s32.totalorder %s2501_s17, 1  ;;  %p173_p1 = scmp.lt.s32.totalorder %s2501_s17, 5 }
  0x2c   : > { %p174_p5 = pnand %p1779_p13, %p173_p1 }
  0x2d   : > { %s179_s29 = sand.u32 (!%p174_p5), 1, %s2485_s13  }
  0x2e   : > { %177 = sbr.rel (%p174_p5) target bundleno = 641 (0x281), region = 32  ;;  %s1780_s30 = sshll.u32 (!%p174_p5), %s179_s29, 7 }
  0x2f   : > { %s180_s5 = scalar_lea.sflag (!%p174_p5), [#allocation5], %s179_s29  ;;  %s2616_s9 = scalar_lea.vmem (!%p174_p5), [#allocation4], %s1780_s30 }
  0x35   : > { %2476 = dma.done.wait (%p2565_p8), %s180_s5, 2048  }
  0x36   : > { %2478 = vsyncadd (%p2565_p8), %s180_s5, 4294965248  ;;  %p205_p6 = scmp.eq.s32.totalorder %s2493_s15, 0 }
  0x37   : > { %v214_v0 = vld [vmem:[%s2956_s1] sm:$0xff] (%p205_p6)  ;;  %vm230_vm0 = vcmask (%p205_p6), 31744   ;;  %v215_v1 = vld [vmem:[%s2956_s1 + $0x8] sm:$0xff] (%p205_p6)  ;;  %v216_v2 = vld [vmem:[%s2956_s1 + $0x10] sm:$0xff] (%p205_p6) }
  0x38   : > { %213 = sbr.rel (!%p205_p6) target bundleno = 64 (0x40), region = 40  ;;  %231 = vst.msk [vmem:[#allocation2] sm:$0xff] (%p205_p6), %vm230_vm0, %v214_v0  ;;  %232 = vst.msk [vmem:[#allocation2 + $0x8] sm:$0xff] (%p205_p6), %vm230_vm0, %v215_v1  ;;  %v217_v3 = vld [vmem:[%s2956_s1 + $0x18] sm:$0xff] (%p205_p6)  ;;  %v218_v4 = vld [vmem:[%s2956_s1 + $0x20] sm:$0xff] (%p205_p6) }
  0x39   : > { %233 = vst.msk [vmem:[#allocation2 + $0x10] sm:$0xff] (%p205_p6), %vm230_vm0, %v216_v2  ;;  %v219_v5 = vld [vmem:[%s2956_s1 + $0x28] sm:$0xff] (%p205_p6)  ;;  %234 = vst.msk [vmem:[#allocation2 + $0x18] sm:$0xff] (%p205_p6), %vm230_vm0, %v217_v3  ;;  %v220_v6 = vld [vmem:[%s2956_s1 + $0x30] sm:$0xff] (%p205_p6) }
  0x3a   : > { %235 = vst.msk [vmem:[#allocation2 + $0x20] sm:$0xff] (%p205_p6), %vm230_vm0, %v218_v4  ;;  %236 = vst.msk [vmem:[#allocation2 + $0x28] sm:$0xff] (%p205_p6), %vm230_vm0, %v219_v5  ;;  %v221_v7 = vld [vmem:[%s2956_s1 + $0x38] sm:$0xff] (%p205_p6)  ;;  %v222_v8 = vld [vmem:[%s2956_s1 + $0x40] sm:$0xff] (%p205_p6) }
  0x3b   : > { %237 = vst.msk [vmem:[#allocation2 + $0x30] sm:$0xff] (%p205_p6), %vm230_vm0, %v220_v6  ;;  %238 = vst.msk [vmem:[#allocation2 + $0x38] sm:$0xff] (%p205_p6), %vm230_vm0, %v221_v7  ;;  %v223_v9 = vld [vmem:[%s2956_s1 + $0x48] sm:$0xff] (%p205_p6)  ;;  %v224_v10 = vld [vmem:[%s2956_s1 + $0x50] sm:$0xff] (%p205_p6) }
  0x3c   : > { %239 = vst.msk [vmem:[#allocation2 + $0x40] sm:$0xff] (%p205_p6), %vm230_vm0, %v222_v8  ;;  %v225_v11 = vld [vmem:[%s2956_s1 + $0x58] sm:$0xff] (%p205_p6)  ;;  %240 = vst.msk [vmem:[#allocation2 + $0x48] sm:$0xff] (%p205_p6), %vm230_vm0, %v223_v9  ;;  %v226_v12 = vld [vmem:[%s2956_s1 + $0x60] sm:$0xff] (%p205_p6) }
  0x3d   : > { %241 = vst.msk [vmem:[#allocation2 + $0x50] sm:$0xff] (%p205_p6), %vm230_vm0, %v224_v10  ;;  %242 = vst.msk [vmem:[#allocation2 + $0x58] sm:$0xff] (%p205_p6), %vm230_vm0, %v225_v11  ;;  %v227_v13 = vld [vmem:[%s2956_s1 + $0x68] sm:$0xff] (%p205_p6)  ;;  %v228_v14 = vld [vmem:[%s2956_s1 + $0x70] sm:$0xff] (%p205_p6) }
  0x3e   : > { %243 = vst.msk [vmem:[#allocation2 + $0x60] sm:$0xff] (%p205_p6), %vm230_vm0, %v226_v12  ;;  %244 = vst.msk [vmem:[#allocation2 + $0x68] sm:$0xff] (%p205_p6), %vm230_vm0, %v227_v13  ;;  %v229_v15 = vld [vmem:[%s2956_s1 + $0x78] sm:$0xff] (%p205_p6) }
  0x3f   : > { %245 = vst.msk [vmem:[#allocation2 + $0x70] sm:$0xff] %vm230_vm0, %v228_v14  ;;  %246 = vst.msk [vmem:[#allocation2 + $0x78] sm:$0xff] %vm230_vm0, %v229_v15 }
  0x40 PF: > { %p267_p8 = scmp.eq.s32.totalorder %s2493_s15, 2  ;;  %v251_v16 = vld [vmem:[%s2616_s9] sm:$0xff]  ;;  %v252_v42 = vld [vmem:[%s2616_s9 + $0x8] sm:$0xff]  ;;  %v253_v44 = vld [vmem:[%s2616_s9 + $0x10] sm:$0xff]  ;;  %p506_p11 = scmp.lt.s32.totalorder %s2493_s15, 3  ;;  %vm436_vm1 = vcmask 31744  }
  0x41   : > { %v259_v17 = vld [vmem:[%s2616_s9 + $0x40] sm:$0xff]  ;;  %2096 = vmatprep.mubr.f32.mxu0 %v251_v16  ;;  %v260_v43 = vld [vmem:[%s2616_s9 + $0x48] sm:$0xff]  ;;  %v261_v45 = vld [vmem:[%s2616_s9 + $0x50] sm:$0xff] }
  0x42   : > { %2108 = vmatprep.mubr.f32.mxu1 %v259_v17  ;;  %s268_s25 = scalar_select %p267_p8, 0, %s2493_s15  ;;  %v254_v46 = vld [vmem:[%s2616_s9 + $0x18] sm:$0xff]  ;;  %v255_v48 = vld [vmem:[%s2616_s9 + $0x20] sm:$0xff]  ;;  %v256_v50 = vld [vmem:[%s2616_s9 + $0x28] sm:$0xff] }
  0x43   : > { %v262_v47 = vld [vmem:[%s2616_s9 + $0x58] sm:$0xff]  ;;  %v263_v49 = vld [vmem:[%s2616_s9 + $0x60] sm:$0xff]  ;;  %v264_v51 = vld [vmem:[%s2616_s9 + $0x68] sm:$0xff] }
  0x44   : > { %s1783_s26 = sshll.u32 %s268_s25, 7  ;;  %v257_v52 = vld [vmem:[%s2616_s9 + $0x30] sm:$0xff]  ;;  %v258_v54 = vld [vmem:[%s2616_s9 + $0x38] sm:$0xff] }
  0x45   : > { %s2691_s28 = scalar_lea.vmem [#allocation2], %s1783_s26  ;;  %v265_v53 = vld [vmem:[%s2616_s9 + $0x70] sm:$0xff]  ;;  %v266_v55 = vld [vmem:[%s2616_s9 + $0x78] sm:$0xff]  ;;  %s1785_s9 = sshll.u32 (%p506_p11), %s2493_s15, 7 }
  0x46   : > { %v272_v18 = vld [vmem:[%s2691_s28] sm:$0xff]  ;;  %v273_v19 = vld [vmem:[%s2691_s28 + $0x8] sm:$0xff]  ;;  %v274_v20 = vld [vmem:[%s2691_s28 + $0x10] sm:$0xff]  ;;  %s1732_s29 = scalar_lea.vmem (%p506_p11), [#allocation2], %s1785_s9 }
  0x47   : > { %v2250_v21 = vpack.c.bf16 %v273_v19, %v272_v18  ;;  %v275_v22 = vld [vmem:[%s2691_s28 + $0x18] sm:$0xff]  ;;  %v276_v24 = vld [vmem:[%s2691_s28 + $0x20] sm:$0xff]  ;;  %v277_v25 = vld [vmem:[%s2691_s28 + $0x28] sm:$0xff] }
  0x48   : > { %v2254_v23 = vpack.c.bf16 %v275_v22, %v274_v20  ;;  %v2258_v26 = vpack.c.bf16 %v277_v25, %v276_v24  ;;  %v278_v27 = vld [vmem:[%s2691_s28 + $0x30] sm:$0xff]  ;;  %v279_v28 = vld [vmem:[%s2691_s28 + $0x38] sm:$0xff]  ;;  %v280_v30 = vld [vmem:[%s2691_s28 + $0x40] sm:$0xff] }
  0x49   : > { %2251 = vmatprep.subr.bf16.mxu0 %v2250_v21  ;;  %2282 = vmatprep.subr.bf16.mxu1 %v2250_v21  ;;  %v2262_v29 = vpack.c.bf16 %v279_v28, %v278_v27  ;;  %v281_v31 = vld [vmem:[%s2691_s28 + $0x48] sm:$0xff]  ;;  %v282_v33 = vld [vmem:[%s2691_s28 + $0x50] sm:$0xff]  ;;  %v283_v34 = vld [vmem:[%s2691_s28 + $0x58] sm:$0xff] }
  0x4a   : > { %2253 = vmatpush3.bf16.msra.mxu0 %v2250_v21  ;;  %2290 = vmatpush3.bf16.msra.mxu1 %v2250_v21  ;;  %v2266_v32 = vpack.c.bf16 %v281_v31, %v280_v30  ;;  %v2270_v35 = vpack.c.bf16 %v283_v34, %v282_v33  ;;  %v284_v36 = vld [vmem:[%s2691_s28 + $0x60] sm:$0xff]  ;;  %v285_v37 = vld [vmem:[%s2691_s28 + $0x68] sm:$0xff]  ;;  %v286_v39 = vld [vmem:[%s2691_s28 + $0x70] sm:$0xff] }
  0x4b   : > { %2255 = vmatprep.subr.bf16.mxu0 %v2254_v23  ;;  %2283 = vmatprep.subr.bf16.mxu1 %v2254_v23  ;;  %v2274_v38 = vpack.c.bf16 %v285_v37, %v284_v36  ;;  %v287_v40 = vld [vmem:[%s2691_s28 + $0x78] sm:$0xff] }
  0x4c   : > { %v2278_v41 = vpack.c.bf16 %v287_v40, %v286_v39 }
  0x4e   : > { %2257 = vmatpush3.bf16.msra.mxu0 %v2254_v23  ;;  %2291 = vmatpush3.bf16.msra.mxu1 %v2254_v23 }
  0x4f   : > { %2259 = vmatprep.subr.bf16.mxu0 %v2258_v26  ;;  %2284 = vmatprep.subr.bf16.mxu1 %v2258_v26 }
  0x52   : > { %2261 = vmatpush3.bf16.msra.mxu0 %v2258_v26  ;;  %2292 = vmatpush3.bf16.msra.mxu1 %v2258_v26 }
  0x53   : > { %2263 = vmatprep.subr.bf16.mxu0 %v2262_v29  ;;  %2285 = vmatprep.subr.bf16.mxu1 %v2262_v29 }
  0x56   : > { %2265 = vmatpush3.bf16.msra.mxu0 %v2262_v29  ;;  %2293 = vmatpush3.bf16.msra.mxu1 %v2262_v29 }
  0x57   : > { %2267 = vmatprep.subr.bf16.mxu0 %v2266_v32  ;;  %2286 = vmatprep.subr.bf16.mxu1 %v2266_v32 }
  0x5a   : > { %2269 = vmatpush3.bf16.msra.mxu0 %v2266_v32  ;;  %2294 = vmatpush3.bf16.msra.mxu1 %v2266_v32 }
  0x5b   : > { %2271 = vmatprep.subr.bf16.mxu0 %v2270_v35  ;;  %2287 = vmatprep.subr.bf16.mxu1 %v2270_v35 }
  0x5e   : > { %2273 = vmatpush3.bf16.msra.mxu0 %v2270_v35  ;;  %2295 = vmatpush3.bf16.msra.mxu1 %v2270_v35 }
  0x5f   : > { %2275 = vmatprep.subr.bf16.mxu0 %v2274_v38  ;;  %2288 = vmatprep.subr.bf16.mxu1 %v2274_v38 }
  0x62   : > { %2277 = vmatpush3.bf16.msra.mxu0 %v2274_v38  ;;  %2296 = vmatpush3.bf16.msra.mxu1 %v2274_v38 }
  0x63   : > { %2279 = vmatprep.subr.bf16.mxu0 %v2278_v41  ;;  %2289 = vmatprep.subr.bf16.mxu1 %v2278_v41 }
  0x66   : > { %2281 = vmatpush3.bf16.msra.mxu0 %v2278_v41  ;;  %2297 = vmatpush3.bf16.msra.mxu1 %v2278_v41 }
  0x69   : > { %2097 = vmatmul.mubr.f32.vlgmr.msra.gmra.mrb[0].mxu0 %v252_v42  ;;  %2109 = vmatmul.mubr.f32.vlgmr.msra.gmra.mrb[0].mxu1 %v260_v43 }
  0x6a   : > { %2099 = vmatprep.mubr.f32.mxu0 %v253_v44  ;;  %2111 = vmatprep.mubr.f32.mxu1 %v261_v45 }
  0x6d   : > { %2100 = vmatmul.mubr.f32.gmra.mrb[2].mxu0 %v254_v46  ;;  %2112 = vmatmul.mubr.f32.gmra.mrb[2].mxu1 %v262_v47 }
  0x6e   : > { %2102 = vmatprep.mubr.f32.mxu0 %v255_v48  ;;  %2114 = vmatprep.mubr.f32.mxu1 %v263_v49 }
  0x71   : > { %2103 = vmatmul.mubr.f32.gmra.mrb[4].mxu0 %v256_v50  ;;  %2115 = vmatmul.mubr.f32.gmra.mrb[4].mxu1 %v264_v51 }
  0x72   : > { %2105 = vmatprep.mubr.f32.mxu0 %v257_v52  ;;  %2117 = vmatprep.mubr.f32.mxu1 %v265_v53 }
  0x75   : > { %2106 = vmatmul.mubr.f32.gmra.mrb[6].mxu0 %v258_v54  ;;  %2118 = vmatmul.mubr.f32.gmra.mrb[6].mxu1 %v266_v55 }
 0x13c   : > { %v2098_v56 = vpop.f32.mrb[0].mxu0  ;;  %v2110_v57 = vpop.f32.mrb[0].mxu1 }
 0x13d   : > { %438 = vst.msk [vmem:[#allocation3 + $0x8] sm:$0xff] %vm436_vm1, %v2098_v56  ;;  %446 = vst.msk [vmem:[#allocation3 + $0x48] sm:$0xff] %vm436_vm1, %v2110_v57  ;;  %v354_v58 = vpop.f32.mrb[1].mxu0  ;;  %v394_v59 = vpop.f32.mrb[1].mxu1 }
 0x13e   : > { %437 = vst.msk [vmem:[#allocation3] sm:$0xff] %vm436_vm1, %v354_v58  ;;  %445 = vst.msk [vmem:[#allocation3 + $0x40] sm:$0xff] %vm436_vm1, %v394_v59 }
 0x140   : > { %v2101_v60 = vpop.f32.mrb[2].mxu0  ;;  %v2113_v61 = vpop.f32.mrb[2].mxu1 }
 0x141   : > { %440 = vst.msk [vmem:[#allocation3 + $0x18] sm:$0xff] %vm436_vm1, %v2101_v60  ;;  %448 = vst.msk [vmem:[#allocation3 + $0x58] sm:$0xff] %vm436_vm1, %v2113_v61  ;;  %v364_v62 = vpop.f32.mrb[3].mxu0  ;;  %v404_v63 = vpop.f32.mrb[3].mxu1 }
 0x142   : > { %439 = vst.msk [vmem:[#allocation3 + $0x10] sm:$0xff] %vm436_vm1, %v364_v62  ;;  %447 = vst.msk [vmem:[#allocation3 + $0x50] sm:$0xff] %vm436_vm1, %v404_v63 }
 0x144   : > { %v2104_v0 = vpop.f32.mrb[4].mxu0  ;;  %v2116_v1 = vpop.f32.mrb[4].mxu1  ;;  %510 = sbr.rel (!%p506_p11) target bundleno = 340 (0x154), region = 52  ;;  %v512_v9 = vld [vmem:[#allocation3 + $0x8] sm:$0xff] (%p506_p11) }
 0x145   : > { %442 = vst.msk [vmem:[#allocation3 + $0x28] sm:$0xff] %vm436_vm1, %v2104_v0  ;;  %450 = vst.msk [vmem:[#allocation3 + $0x68] sm:$0xff] %vm436_vm1, %v2116_v1  ;;  %v374_v2 = vpop.f32.mrb[5].mxu0  ;;  %v414_v3 = vpop.f32.mrb[5].mxu1  ;;  %v511_v8 = vld [vmem:[#allocation3] sm:$0xff] (%p506_p11)  ;;  %v520_v17 = vld [vmem:[#allocation3 + $0x48] sm:$0xff] (%p506_p11) }
 0x146   : > { %441 = vst.msk [vmem:[#allocation3 + $0x20] sm:$0xff] %vm436_vm1, %v374_v2  ;;  %449 = vst.msk [vmem:[#allocation3 + $0x60] sm:$0xff] %vm436_vm1, %v414_v3  ;;  %v519_v16 = vld [vmem:[#allocation3 + $0x40] sm:$0xff] (%p506_p11) }
 0x147   : > { %1786 = vst.msk [vmem:[%s1732_s29 + $0x80] sm:$0xff] (%p506_p11), %vm436_vm1, %v511_v8  ;;  %1787 = vst.msk [vmem:[%s1732_s29 + $0x88] sm:$0xff] (%p506_p11), %vm436_vm1, %v512_v9 }
 0x148   : > { %v2107_v4 = vpop.f32.mrb[6].mxu0  ;;  %v2119_v5 = vpop.f32.mrb[6].mxu1  ;;  %v514_v11 = vld [vmem:[#allocation3 + $0x18] sm:$0xff] (%p506_p11)  ;;  %1794 = vst.msk [vmem:[%s1732_s29 + $0xc0] sm:$0xff] (%p506_p11), %vm436_vm1, %v519_v16  ;;  %1795 = vst.msk [vmem:[%s1732_s29 + $0xc8] sm:$0xff] (%p506_p11), %vm436_vm1, %v520_v17 }
 0x149   : > { %444 = vst.msk [vmem:[#allocation3 + $0x38] sm:$0xff] %vm436_vm1, %v2107_v4  ;;  %452 = vst.msk [vmem:[#allocation3 + $0x78] sm:$0xff] %vm436_vm1, %v2119_v5  ;;  %v384_v6 = vpop.f32.mrb[7].mxu0  ;;  %v424_v7 = vpop.f32.mrb[7].mxu1  ;;  %v513_v10 = vld [vmem:[#allocation3 + $0x10] sm:$0xff] (%p506_p11)  ;;  %v522_v19 = vld [vmem:[#allocation3 + $0x58] sm:$0xff] (%p506_p11) }
 0x14a   : > { %443 = vst.msk [vmem:[#allocation3 + $0x30] sm:$0xff] %vm436_vm1, %v384_v6  ;;  %451 = vst.msk [vmem:[#allocation3 + $0x70] sm:$0xff] %vm436_vm1, %v424_v7  ;;  %v521_v18 = vld [vmem:[#allocation3 + $0x50] sm:$0xff] (%p506_p11) }
 0x14b   : > { %1788 = vst.msk [vmem:[%s1732_s29 + $0x90] sm:$0xff] %vm436_vm1, %v513_v10  ;;  %1789 = vst.msk [vmem:[%s1732_s29 + $0x98] sm:$0xff] %vm436_vm1, %v514_v11 }
 0x14c   : > { %v516_v13 = vld [vmem:[#allocation3 + $0x28] sm:$0xff]  ;;  %1796 = vst.msk [vmem:[%s1732_s29 + $0xd0] sm:$0xff] %vm436_vm1, %v521_v18  ;;  %1797 = vst.msk [vmem:[%s1732_s29 + $0xd8] sm:$0xff] %vm436_vm1, %v522_v19 }
 0x14d   : > { %v515_v12 = vld [vmem:[#allocation3 + $0x20] sm:$0xff]  ;;  %1791 = vst.msk [vmem:[%s1732_s29 + $0xa8] sm:$0xff] %vm436_vm1, %v516_v13  ;;  %v524_v21 = vld [vmem:[#allocation3 + $0x68] sm:$0xff] }
 0x14e   : > { %1790 = vst.msk [vmem:[%s1732_s29 + $0xa0] sm:$0xff] %vm436_vm1, %v515_v12  ;;  %v523_v20 = vld [vmem:[#allocation3 + $0x60] sm:$0xff]  ;;  %1799 = vst.msk [vmem:[%s1732_s29 + $0xe8] sm:$0xff] %vm436_vm1, %v524_v21 }
 0x14f   : > { %1798 = vst.msk [vmem:[%s1732_s29 + $0xe0] sm:$0xff] %vm436_vm1, %v523_v20 }
 0x150   : > { %v518_v15 = vld [vmem:[#allocation3 + $0x38] sm:$0xff] }
 0x151   : > { %v517_v14 = vld [vmem:[#allocation3 + $0x30] sm:$0xff]  ;;  %1793 = vst.msk [vmem:[%s1732_s29 + $0xb8] sm:$0xff] %vm436_vm1, %v518_v15  ;;  %v526_v23 = vld [vmem:[#allocation3 + $0x78] sm:$0xff] }
 0x152   : > { %1792 = vst.msk [vmem:[%s1732_s29 + $0xb0] sm:$0xff] %vm436_vm1, %v517_v14  ;;  %v525_v22 = vld [vmem:[#allocation3 + $0x70] sm:$0xff]  ;;  %1801 = vst.msk [vmem:[%s1732_s29 + $0xf8] sm:$0xff] %vm436_vm1, %v526_v23 }
 0x153   : > { %1800 = vst.msk [vmem:[%s1732_s29 + $0xf0] sm:$0xff] %vm436_vm1, %v525_v22 }
 0x154 PF: > { %p548_p7 = scmp.eq.s32.totalorder %s2493_s15, 3 }
 0x155   : > { %v588_v24 = vld [vmem:[%s2957_s2] sm:$0xf] (%p548_p7)  ;;  %vm638_vm2 = vcmask (%p548_p7), 1043456   ;;  %v2766_v25 = vld [vmem:[%s2957_s2 + $0x4] sm:$0xf] (%p548_p7)  ;;  %v554_v63 = vld [vmem:[#allocation3 + $0x8] sm:$0xff] (%p548_p7) }
 0x156   : > { %552 = sbr.rel (!%p548_p7) target bundleno = 641 (0x281), region = 56  ;;  %2120 = vmatprep.subr.msk.mxu1 (%p548_p7), %vm638_vm2, %v588_v24  ;;  %2172 = vmatprep.subr.msk.mxu0 (%p548_p7), %vm638_vm2, %v2766_v25  ;;  %v1803_v29 = vld [vmem:[%s2957_s2 + $0x10] sm:$0xf] (%p548_p7)  ;;  %v1888_v31 = vld [vmem:[%s2957_s2 + $0x8] sm:$0xf] (%p548_p7)  ;;  %v553_v61 = vld [vmem:[#allocation3] sm:$0xff] (%p548_p7) }
 0x157   : > { %2121 = vmatpush3.msk.msra.mxu1 (%p548_p7), %vm638_vm2, %v588_v24  ;;  %2173 = vmatpush3.msk.msra.mxu0 (%p548_p7), %vm638_vm2, %v2766_v25  ;;  %v1922_v38 = vld [vmem:[%s2957_s2 + $0xc] sm:$0xf] (%p548_p7)  ;;  %v555_v1 = vld [vmem:[#allocation3 + $0x10] sm:$0xff] (%p548_p7)  ;;  %v556_v3 = vld [vmem:[#allocation3 + $0x18] sm:$0xff] (%p548_p7)  ;;  %vm1680_vm3 = vcmask (%p548_p7), 64512  }
 0x158   : > { %2146 = vmatprep.subr.msk.mxu1 (%p548_p7), %vm638_vm2, %v1803_v29  ;;  %2198 = vmatprep.subr.msk.mxu0 (%p548_p7), %vm638_vm2, %v1888_v31  ;;  %v557_v5 = vld [vmem:[#allocation3 + $0x20] sm:$0xff] (%p548_p7)  ;;  %v558_v7 = vld [vmem:[#allocation3 + $0x28] sm:$0xff] (%p548_p7)  ;;  %v563_v17 = vld [vmem:[#allocation3 + $0x50] sm:$0xff] (%p548_p7) }
 0x159   : > { %v560_v11 = vld [vmem:[#allocation3 + $0x38] sm:$0xff] (%p548_p7)  ;;  %v561_v13 = vld [vmem:[#allocation3 + $0x40] sm:$0xff] (%p548_p7)  ;;  %v562_v15 = vld [vmem:[#allocation3 + $0x48] sm:$0xff] (%p548_p7) }
 0x15a   : > { %v572_v26 = vld [vmem:[#allocation2] sm:$0xff] (%p548_p7)  ;;  %v573_v28 = vld [vmem:[#allocation2 + $0x8] sm:$0xff] (%p548_p7)  ;;  %v574_v32 = vld [vmem:[#allocation2 + $0x10] sm:$0xff] (%p548_p7) }
 0x15b   : > { %v1838_v27 = vld [vmem:[#allocation2 + $0x80] sm:$0xff] (%p548_p7)  ;;  %2122 = vmatprep.mubr.msk.f32.mxu1 (%p548_p7), %vm436_vm1, %v572_v26  ;;  %v1839_v30 = vld [vmem:[#allocation2 + $0x88] sm:$0xff] (%p548_p7)  ;;  %v1840_v33 = vld [vmem:[#allocation2 + $0x90] sm:$0xff] (%p548_p7) }
 0x15c   : > { %2174 = vmatprep.mubr.msk.f32.mxu0 (%p548_p7), %vm436_vm1, %v1838_v27  ;;  %2123 = vmatmul.mubr.msk.f32.vlgmr.msra.gmra.mrb[0].mxu1 (%p548_p7), %vm436_vm1, %v573_v28  ;;  %v575_v34 = vld [vmem:[#allocation2 + $0x18] sm:$0xff] (%p548_p7)  ;;  %v576_v36 = vld [vmem:[#allocation2 + $0x20] sm:$0xff] (%p548_p7)  ;;  %v577_v39 = vld [vmem:[#allocation2 + $0x28] sm:$0xff] (%p548_p7) }
 0x15d   : > { %2175 = vmatmul.mubr.msk.f32.vlgmr.msra.gmra.mrb[0].mxu0 %vm436_vm1, %v1839_v30  ;;  %2147 = vmatpush3.msk.msra.mxu1 %vm638_vm2, %v1803_v29  ;;  %v1841_v35 = vld [vmem:[#allocation2 + $0x98] sm:$0xff]  ;;  %v1842_v37 = vld [vmem:[#allocation2 + $0xa0] sm:$0xff]  ;;  %v1843_v40 = vld [vmem:[#allocation2 + $0xa8] sm:$0xff] }
 0x15e   : > { %2199 = vmatpush3.msk.msra.mxu0 %vm638_vm2, %v1888_v31  ;;  %2125 = vmatprep.mubr.msk.f32.mxu1 %vm436_vm1, %v574_v32  ;;  %v578_v41 = vld [vmem:[#allocation2 + $0x30] sm:$0xff]  ;;  %v579_v43 = vld [vmem:[#allocation2 + $0x38] sm:$0xff]  ;;  %v580_v45 = vld [vmem:[#allocation2 + $0x40] sm:$0xff] }
 0x15f   : > { %2177 = vmatprep.mubr.msk.f32.mxu0 %vm436_vm1, %v1840_v33  ;;  %2298 = vmatprep.subr.msk.mxu1 %vm638_vm2, %v2766_v25  ;;  %v1844_v42 = vld [vmem:[#allocation2 + $0xb0] sm:$0xff]  ;;  %v1845_v44 = vld [vmem:[#allocation2 + $0xb8] sm:$0xff]  ;;  %v1872_v46 = vld [vmem:[#allocation2 + $0x100] sm:$0xff] }
 0x160   : > { %2126 = vmatmul.mubr.msk.f32.gmra.mrb[2].mxu1 %vm436_vm1, %v575_v34  ;;  %2224 = vmatprep.subr.msk.mxu0 %vm638_vm2, %v1922_v38  ;;  %v581_v47 = vld [vmem:[#allocation2 + $0x48] sm:$0xff]  ;;  %v582_v49 = vld [vmem:[#allocation2 + $0x50] sm:$0xff]  ;;  %v583_v51 = vld [vmem:[#allocation2 + $0x58] sm:$0xff] }
 0x161   : > { %2178 = vmatmul.mubr.msk.f32.gmra.mrb[2].mxu0 %vm436_vm1, %v1841_v35  ;;  %2128 = vmatprep.mubr.msk.f32.mxu1 %vm436_vm1, %v576_v36  ;;  %v1873_v48 = vld [vmem:[#allocation2 + $0x108] sm:$0xff]  ;;  %v1874_v50 = vld [vmem:[#allocation2 + $0x110] sm:$0xff]  ;;  %v1875_v52 = vld [vmem:[#allocation2 + $0x118] sm:$0xff] }
 0x162   : > { %2180 = vmatprep.mubr.msk.f32.mxu0 %vm436_vm1, %v1842_v37  ;;  %v584_v53 = vld [vmem:[#allocation2 + $0x60] sm:$0xff]  ;;  %v585_v55 = vld [vmem:[#allocation2 + $0x68] sm:$0xff]  ;;  %v586_v57 = vld [vmem:[#allocation2 + $0x70] sm:$0xff] }
 0x163   : > { %v1876_v54 = vld [vmem:[#allocation2 + $0x120] sm:$0xff]  ;;  %v1877_v56 = vld [vmem:[#allocation2 + $0x128] sm:$0xff]  ;;  %v1878_v58 = vld [vmem:[#allocation2 + $0x130] sm:$0xff] }
 0x164   : > { %2129 = vmatmul.mubr.msk.f32.gmra.mrb[4].mxu1 %vm436_vm1, %v577_v39  ;;  %v587_v59 = vld [vmem:[#allocation2 + $0x78] sm:$0xff]  ;;  %v1880_v62 = vld [vmem:[#allocation2 + $0x140] sm:$0xff]  ;;  %v1881_v0 = vld [vmem:[#allocation2 + $0x148] sm:$0xff] }
 0x165   : > { %2181 = vmatmul.mubr.msk.f32.gmra.mrb[4].mxu0 %vm436_vm1, %v1843_v40  ;;  %2131 = vmatprep.mubr.msk.f32.mxu1 %vm436_vm1, %v578_v41  ;;  %v1879_v60 = vld [vmem:[#allocation2 + $0x138] sm:$0xff]  ;;  %v1882_v2 = vld [vmem:[#allocation2 + $0x150] sm:$0xff]  ;;  %v1884_v6 = vld [vmem:[#allocation2 + $0x160] sm:$0xff] }
 0x166   : > { %2183 = vmatprep.mubr.msk.f32.mxu0 %vm436_vm1, %v1844_v42  ;;  %v1883_v4 = vld [vmem:[#allocation2 + $0x158] sm:$0xff]  ;;  %v1885_v8 = vld [vmem:[#allocation2 + $0x168] sm:$0xff]  ;;  %v559_v9 = vld [vmem:[#allocation3 + $0x30] sm:$0xff] }
 0x167   : > { %v1886_v10 = vld [vmem:[#allocation2 + $0x170] sm:$0xff]  ;;  %v1887_v12 = vld [vmem:[#allocation2 + $0x178] sm:$0xff]  ;;  %v1906_v14 = vld [vmem:[#allocation2 + $0x180] sm:$0xff] }
 0x168   : > { %2132 = vmatmul.mubr.msk.f32.gmra.mrb[6].mxu1 %vm436_vm1, %v579_v43  ;;  %v1907_v16 = vld [vmem:[#allocation2 + $0x188] sm:$0xff]  ;;  %v1908_v18 = vld [vmem:[#allocation2 + $0x190] sm:$0xff]  ;;  %v564_v19 = vld [vmem:[#allocation3 + $0x58] sm:$0xff] }
 0x169   : > { %2184 = vmatmul.mubr.msk.f32.gmra.mrb[6].mxu0 %vm436_vm1, %v1845_v44  ;;  %2134 = vmatprep.mubr.msk.f32.mxu1 %vm436_vm1, %v580_v45  ;;  %v1909_v20 = vld [vmem:[#allocation2 + $0x198] sm:$0xff]  ;;  %v565_v21 = vld [vmem:[#allocation3 + $0x60] sm:$0xff]  ;;  %v566_v23 = vld [vmem:[#allocation3 + $0x68] sm:$0xff] }
 0x16a   : > { %2200 = vmatprep.mubr.msk.f32.mxu0 %vm436_vm1, %v1872_v46  ;;  %v1910_v22 = vld [vmem:[#allocation2 + $0x1a0] sm:$0xff]  ;;  %v1911_v24 = vld [vmem:[#allocation2 + $0x1a8] sm:$0xff]  ;;  %v1912_v26 = vld [vmem:[#allocation2 + $0x1b0] sm:$0xff] }
 0x16b   : > { %v568_v27 = vld [vmem:[#allocation3 + $0x78] sm:$0xff]  ;;  %v1846_v29 = vld [vmem:[#allocation2 + $0xc0] sm:$0xff]  ;;  %v1847_v31 = vld [vmem:[#allocation2 + $0xc8] sm:$0xff] }
 0x16c   : > { %2135 = vmatmul.mubr.msk.f32.gmra.mrb[8].mxu1 %vm436_vm1, %v581_v47  ;;  %v1913_v28 = vld [vmem:[#allocation2 + $0x1b8] sm:$0xff]  ;;  %v1914_v30 = vld [vmem:[#allocation2 + $0x1c0] sm:$0xff]  ;;  %v1915_v32 = vld [vmem:[#allocation2 + $0x1c8] sm:$0xff] }
 0x16d   : > { %2201 = vmatmul.mubr.msk.f32.vlgmr.msra.gmra.mrb[0].mxu0 %vm436_vm1, %v1873_v48  ;;  %2137 = vmatprep.mubr.msk.f32.mxu1 %vm436_vm1, %v582_v49  ;;  %v1848_v33 = vld [vmem:[#allocation2 + $0xd0] sm:$0xff]  ;;  %v1849_v35 = vld [vmem:[#allocation2 + $0xd8] sm:$0xff]  ;;  %v1850_v37 = vld [vmem:[#allocation2 + $0xe0] sm:$0xff] }
 0x16e   : > { %2225 = vmatpush3.msk.msra.mxu0 %vm638_vm2, %v1922_v38  ;;  %2203 = vmatprep.mubr.msk.f32.mxu0 %vm436_vm1, %v1874_v50  ;;  %v1916_v34 = vld [vmem:[#allocation2 + $0x1d0] sm:$0xff]  ;;  %v1917_v36 = vld [vmem:[#allocation2 + $0x1d8] sm:$0xff]  ;;  %v1918_v38 = vld [vmem:[#allocation2 + $0x1e0] sm:$0xff] }
 0x16f   : > { %v1851_v39 = vld [vmem:[#allocation2 + $0xe8] sm:$0xff]  ;;  %v1852_v41 = vld [vmem:[#allocation2 + $0xf0] sm:$0xff]  ;;  %v1853_v43 = vld [vmem:[#allocation2 + $0xf8] sm:$0xff] }
 0x170   : > { %2138 = vmatmul.mubr.msk.f32.gmra.mrb[10].mxu1 %vm436_vm1, %v583_v51  ;;  %v1919_v40 = vld [vmem:[#allocation2 + $0x1e8] sm:$0xff]  ;;  %v1920_v42 = vld [vmem:[#allocation2 + $0x1f0] sm:$0xff]  ;;  %v1921_v44 = vld [vmem:[#allocation2 + $0x1f8] sm:$0xff] }
 0x171   : > { %2204 = vmatmul.mubr.msk.f32.gmra.mrb[2].mxu0 %vm436_vm1, %v1875_v52  ;;  %2140 = vmatprep.mubr.msk.f32.mxu1 %vm436_vm1, %v584_v53 }
 0x172   : > { %2206 = vmatprep.mubr.msk.f32.mxu0 %vm436_vm1, %v1876_v54 }
 0x174   : > { %2141 = vmatmul.mubr.msk.f32.gmra.mrb[12].mxu1 %vm436_vm1, %v585_v55 }
 0x175   : > { %2207 = vmatmul.mubr.msk.f32.gmra.mrb[4].mxu0 %vm436_vm1, %v1877_v56  ;;  %2143 = vmatprep.mubr.msk.f32.mxu1 %vm436_vm1, %v586_v57 }
 0x176   : > { %2209 = vmatprep.mubr.msk.f32.mxu0 %vm436_vm1, %v1878_v58 }
 0x178   : > { %2144 = vmatmul.mubr.msk.f32.gmra.mrb[14].mxu1 %vm436_vm1, %v587_v59 }
 0x179   : > { %2210 = vmatmul.mubr.msk.f32.gmra.mrb[6].mxu0 %vm436_vm1, %v1879_v60  ;;  %2148 = vmatprep.mubr.msk.f32.mxu1 %vm436_vm1, %v553_v61 }
 0x17a   : > { %2212 = vmatprep.mubr.msk.f32.mxu0 %vm436_vm1, %v1880_v62 }
 0x17c   : > { %2149 = vmatmul.mubr.msk.f32.vlgmr.msra.gmra.mrb[0].mxu1 %vm436_vm1, %v554_v63 }
 0x17d   : > { %2213 = vmatmul.mubr.msk.f32.gmra.mrb[8].mxu0 %vm436_vm1, %v1881_v0  ;;  %2299 = vmatpush3.msk.msra.mxu1 %vm638_vm2, %v2766_v25  ;;  %v567_v25 = vld [vmem:[#allocation3 + $0x70] sm:$0xff] }
 0x17e   : > { %2151 = vmatprep.mubr.msk.f32.mxu1 %vm436_vm1, %v555_v1  ;;  %2215 = vmatprep.mubr.msk.f32.mxu0 %vm436_vm1, %v1882_v2 }
 0x180   : > { %2152 = vmatmul.mubr.msk.f32.gmra.mrb[2].mxu1 %vm436_vm1, %v556_v3 }
 0x181   : > { %2216 = vmatmul.mubr.msk.f32.gmra.mrb[10].mxu0 %vm436_vm1, %v1883_v4  ;;  %2154 = vmatprep.mubr.msk.f32.mxu1 %vm436_vm1, %v557_v5 }
 0x182   : > { %2218 = vmatprep.mubr.msk.f32.mxu0 %vm436_vm1, %v1884_v6 }
 0x184   : > { %2155 = vmatmul.mubr.msk.f32.gmra.mrb[4].mxu1 %vm436_vm1, %v558_v7 }
 0x185   : > { %2219 = vmatmul.mubr.msk.f32.gmra.mrb[12].mxu0 %vm436_vm1, %v1885_v8  ;;  %2157 = vmatprep.mubr.msk.f32.mxu1 %vm436_vm1, %v559_v9 }
 0x186   : > { %2221 = vmatprep.mubr.msk.f32.mxu0 %vm436_vm1, %v1886_v10 }
 0x188   : > { %2158 = vmatmul.mubr.msk.f32.gmra.mrb[6].mxu1 %vm436_vm1, %v560_v11 }
 0x189   : > { %2222 = vmatmul.mubr.msk.f32.gmra.mrb[14].mxu0 %vm436_vm1, %v1887_v12  ;;  %2160 = vmatprep.mubr.msk.f32.mxu1 %vm436_vm1, %v561_v13 }
 0x18a   : > { %2226 = vmatprep.mubr.msk.f32.mxu0 %vm436_vm1, %v1906_v14 }
 0x18c   : > { %2161 = vmatmul.mubr.msk.f32.gmra.mrb[8].mxu1 %vm436_vm1, %v562_v15 }
 0x18d   : > { %2227 = vmatmul.mubr.msk.f32.vlgmr.msra.gmra.mrb[0].mxu0 %vm436_vm1, %v1907_v16  ;;  %2163 = vmatprep.mubr.msk.f32.mxu1 %vm436_vm1, %v563_v17 }
 0x18e   : > { %2229 = vmatprep.mubr.msk.f32.mxu0 %vm436_vm1, %v1908_v18 }
 0x190   : > { %2164 = vmatmul.mubr.msk.f32.gmra.mrb[10].mxu1 %vm436_vm1, %v564_v19 }
 0x191   : > { %2230 = vmatmul.mubr.msk.f32.gmra.mrb[2].mxu0 %vm436_vm1, %v1909_v20  ;;  %2166 = vmatprep.mubr.msk.f32.mxu1 %vm436_vm1, %v565_v21 }
 0x192   : > { %2232 = vmatprep.mubr.msk.f32.mxu0 %vm436_vm1, %v1910_v22 }
 0x194   : > { %2167 = vmatmul.mubr.msk.f32.gmra.mrb[12].mxu1 %vm436_vm1, %v566_v23 }
 0x195   : > { %2233 = vmatmul.mubr.msk.f32.gmra.mrb[4].mxu0 %vm436_vm1, %v1911_v24  ;;  %2169 = vmatprep.mubr.msk.f32.mxu1 %vm436_vm1, %v567_v25 }
 0x196   : > { %2235 = vmatprep.mubr.msk.f32.mxu0 %vm436_vm1, %v1912_v26 }
 0x198   : > { %2170 = vmatmul.mubr.msk.f32.gmra.mrb[14].mxu1 %vm436_vm1, %v568_v27 }
 0x199   : > { %2236 = vmatmul.mubr.msk.f32.gmra.mrb[6].mxu0 %vm436_vm1, %v1913_v28  ;;  %2186 = vmatprep.mubr.msk.f32.mxu1 %vm436_vm1, %v1846_v29 }
 0x19a   : > { %2238 = vmatprep.mubr.msk.f32.mxu0 %vm436_vm1, %v1914_v30 }
 0x19c   : > { %2187 = vmatmul.mubr.msk.f32.vlgmr.msra.gmra.mrb[8].mxu1 %vm436_vm1, %v1847_v31 }
 0x19d   : > { %2239 = vmatmul.mubr.msk.f32.gmra.mrb[8].mxu0 %vm436_vm1, %v1915_v32  ;;  %2189 = vmatprep.mubr.msk.f32.mxu1 %vm436_vm1, %v1848_v33 }
 0x19e   : > { %2241 = vmatprep.mubr.msk.f32.mxu0 %vm436_vm1, %v1916_v34 }
 0x1a0   : > { %2190 = vmatmul.mubr.msk.f32.gmra.mrb[10].mxu1 %vm436_vm1, %v1849_v35 }
 0x1a1   : > { %2242 = vmatmul.mubr.msk.f32.gmra.mrb[10].mxu0 %vm436_vm1, %v1917_v36  ;;  %2192 = vmatprep.mubr.msk.f32.mxu1 %vm436_vm1, %v1850_v37 }
 0x1a2   : > { %2244 = vmatprep.mubr.msk.f32.mxu0 %vm436_vm1, %v1918_v38 }
 0x1a4   : > { %2193 = vmatmul.mubr.msk.f32.gmra.mrb[12].mxu1 %vm436_vm1, %v1851_v39 }
 0x1a5   : > { %2245 = vmatmul.mubr.msk.f32.gmra.mrb[12].mxu0 %vm436_vm1, %v1919_v40  ;;  %2195 = vmatprep.mubr.msk.f32.mxu1 %vm436_vm1, %v1852_v41 }
 0x1a6   : > { %2247 = vmatprep.mubr.msk.f32.mxu0 %vm436_vm1, %v1920_v42 }
 0x1a8   : > { %2196 = vmatmul.mubr.msk.f32.gmra.mrb[14].mxu1 %vm436_vm1, %v1853_v43 }
 0x1a9   : > { %2248 = vmatmul.mubr.msk.f32.gmra.mrb[14].mxu0 %vm436_vm1, %v1921_v44 }
 0x24f   : > { %v2150_v45 = vpop.f32.mrb[0].mxu1 }
 0x250   : > { %v904_v46 = vpop.f32.mrb[1].mxu1 }
 0x253   : > { %v2153_v47 = vpop.f32.mrb[2].mxu1 }
 0x254   : > { %v914_v48 = vpop.f32.mrb[3].mxu1 }
 0x257   : > { %v2156_v49 = vpop.f32.mrb[4].mxu1 }
 0x258   : > { %v924_v50 = vpop.f32.mrb[5].mxu1 }
 0x25b   : > { %v2159_v51 = vpop.f32.mrb[6].mxu1 }
 0x25c   : > { %v934_v52 = vpop.f32.mrb[7].mxu1 }
 0x260   : > { %v2228_v53 = vpop.f32.mrb[0].mxu0 }
 0x261   : > { %v2300_v54 = vadd.f32 %v2228_v53, %v2150_v45  ;;  %v1584_v55 = vpop.f32.mrb[1].mxu0 }
 0x262   : > { %v2301_v56 = vadd.f32 %v1584_v55, %v904_v46 }
 0x263   : > { %1682 = vst.msk [vmem:[%s2958_s3 + $0x8] sm:$0xff] %vm1680_vm3, %v2300_v54 }
 0x264   : > { %1681 = vst.msk [vmem:[%s2958_s3] sm:$0xff] %vm1680_vm3, %v2301_v56  ;;  %v2231_v57 = vpop.f32.mrb[2].mxu0 }
 0x265   : > { %v2302_v58 = vadd.f32 %v2231_v57, %v2153_v47  ;;  %v1594_v59 = vpop.f32.mrb[3].mxu0 }
 0x266   : > { %v2303_v60 = vadd.f32 %v1594_v59, %v914_v48 }
 0x267   : > { %1684 = vst.msk [vmem:[%s2958_s3 + $0x18] sm:$0xff] %vm1680_vm3, %v2302_v58 }
 0x268   : > { %1683 = vst.msk [vmem:[%s2958_s3 + $0x10] sm:$0xff] %vm1680_vm3, %v2303_v60  ;;  %v2234_v61 = vpop.f32.mrb[4].mxu0 }
 0x269   : > { %v2304_v62 = vadd.f32 %v2234_v61, %v2156_v49  ;;  %v1604_v63 = vpop.f32.mrb[5].mxu0 }
 0x26a   : > { %v2305_v0 = vadd.f32 %v1604_v63, %v924_v50 }
 0x26b   : > { %1686 = vst.msk [vmem:[%s2958_s3 + $0x28] sm:$0xff] %vm1680_vm3, %v2304_v62 }
 0x26c   : > { %1685 = vst.msk [vmem:[%s2958_s3 + $0x20] sm:$0xff] %vm1680_vm3, %v2305_v0  ;;  %v2237_v1 = vpop.f32.mrb[6].mxu0 }
 0x26d   : > { %v2306_v2 = vadd.f32 %v2237_v1, %v2159_v51  ;;  %v1614_v3 = vpop.f32.mrb[7].mxu0 }
 0x26e   : > { %v2307_v4 = vadd.f32 %v1614_v3, %v934_v52 }
 0x26f   : > { %1688 = vst.msk [vmem:[%s2958_s3 + $0x38] sm:$0xff] %vm1680_vm3, %v2306_v2  ;;  %v2188_v5 = vpop.f32.mrb[8].mxu1 }
 0x270   : > { %1687 = vst.msk [vmem:[%s2958_s3 + $0x30] sm:$0xff] %vm1680_vm3, %v2307_v4  ;;  %v2240_v6 = vpop.f32.mrb[8].mxu0  ;;  %v1160_v7 = vpop.f32.mrb[9].mxu1 }
 0x271   : > { %v2308_v8 = vadd.f32 %v2240_v6, %v2188_v5  ;;  %v1624_v9 = vpop.f32.mrb[9].mxu0 }
 0x272   : > { %v2309_v10 = vadd.f32 %v1624_v9, %v1160_v7 }
 0x273   : > { %1690 = vst.msk [vmem:[%s2958_s3 + $0x48] sm:$0xff] %vm1680_vm3, %v2308_v8  ;;  %v2191_v11 = vpop.f32.mrb[10].mxu1 }
 0x274   : > { %1689 = vst.msk [vmem:[%s2958_s3 + $0x40] sm:$0xff] %vm1680_vm3, %v2309_v10  ;;  %v2243_v12 = vpop.f32.mrb[10].mxu0  ;;  %v1170_v13 = vpop.f32.mrb[11].mxu1 }
 0x275   : > { %v2310_v14 = vadd.f32 %v2243_v12, %v2191_v11  ;;  %v1634_v15 = vpop.f32.mrb[11].mxu0 }
 0x276   : > { %v2311_v16 = vadd.f32 %v1634_v15, %v1170_v13 }
 0x277   : > { %1692 = vst.msk [vmem:[%s2958_s3 + $0x58] sm:$0xff] %vm1680_vm3, %v2310_v14  ;;  %v2194_v17 = vpop.f32.mrb[12].mxu1 }
 0x278   : > { %1691 = vst.msk [vmem:[%s2958_s3 + $0x50] sm:$0xff] %vm1680_vm3, %v2311_v16  ;;  %v2246_v18 = vpop.f32.mrb[12].mxu0  ;;  %v1180_v19 = vpop.f32.mrb[13].mxu1 }
 0x279   : > { %v2312_v20 = vadd.f32 %v2246_v18, %v2194_v17  ;;  %v1644_v21 = vpop.f32.mrb[13].mxu0 }
 0x27a   : > { %v2313_v22 = vadd.f32 %v1644_v21, %v1180_v19 }
 0x27b   : > { %1694 = vst.msk [vmem:[%s2958_s3 + $0x68] sm:$0xff] %vm1680_vm3, %v2312_v20  ;;  %v2197_v23 = vpop.f32.mrb[14].mxu1 }
 0x27c   : > { %1693 = vst.msk [vmem:[%s2958_s3 + $0x60] sm:$0xff] %vm1680_vm3, %v2313_v22  ;;  %v2249_v24 = vpop.f32.mrb[14].mxu0  ;;  %v1190_v25 = vpop.f32.mrb[15].mxu1 }
 0x27d   : > { %v2314_v26 = vadd.f32 %v2249_v24, %v2197_v23  ;;  %v1654_v27 = vpop.f32.mrb[15].mxu0 }
 0x27e   : > { %v2315_v28 = vadd.f32 %v1654_v27, %v1190_v25 }
 0x27f   : > { %1696 = vst.msk [vmem:[%s2958_s3 + $0x78] sm:$0xff] %vm1680_vm3, %v2314_v26 }
 0x280   : > { %1695 = vst.msk [vmem:[%s2958_s3 + $0x70] sm:$0xff] %vm1680_vm3, %v2315_v28 }
 0x281 PF: > { %s16_s17 = sadd.s32 1, %s2501_s17   ;;  %s2961_s12 = smov %s2485_s13 }
 0x282   : > { %p13_p9 = scmp.ge.s32.totalorder %s16_s17, 6   ;;  %s2962_s13 = smov %s2489_s14 }
 0x283   : > { %s2963_s14 = smov %s2572_s27  ;;  %s2964_s15 = smov %s2497_s16 }
 0x284   : > { %s2965_s16 = smov %s2967_s19  ;;  %15 = sbr.rel (!%p13_p9) target bundleno = 4 (0x4), region = 100 }
 0x28b   :  { %1708 = vsyncpa [#allocation5], 1 }
 0x28c   :  { %1710 = vsyncpa [#allocation5 + $0x1], 1 }

</bundles_post_ra>
